<compile_context>
chip_gen: v7x
topology: tpu7x:2x2x1
jax: 0.10.0
libtpu: 0.0.40
codegen_flags: <defaults>
</compile_context>

<pallas_src>
import math
import functools

import jax
import jax.numpy as jnp
from jax.experimental import pallas as pl
from jax.experimental.pallas import tpu as pltpu


# ----------------------------- helpers ------------------------------------- #

def _layernorm(x, g, b, eps=1e-5):
    mu = jnp.mean(x, axis=-1, keepdims=True)
    var = jnp.mean((x - mu) ** 2, axis=-1, keepdims=True)
    return (x - mu) * jax.lax.rsqrt(var + eps) * g + b


# ----------------------------- kernels ------------------------------------- #

def _qkv_kernel(x_ref, w_ref, b_ref, qkv_ref):
    """Per-batch fused Q/K/V projection: (S, D) @ (D, N*(2*d_k+d_v)) + b."""
    x = x_ref[0]                                                   # (S, D)
    qkv_ref[0] = (jnp.dot(x, w_ref[...], preferred_element_type=jnp.float32)
                  + b_ref[...])


def _attn_ffn_kernel(q_ref, k_ref, v_ref, mask_ref, resid_ref,
                     wo_ref, bo_ref, g1_ref, be1_ref,
                     w1_ref, b1_ref, w2_ref, b2_ref, g2_ref, be2_ref,
                     out_ref, concat_ref, *, N, d_k, d_v):
    """Per-batch: multi-head attention (heads looped in-kernel, concat built in
    VMEM), then W_O + residual + LN, then FFN (fc1/relu/fc2) + residual + LN."""
    mask = mask_ref[0]                                             # (S, S) int32
    scale = jnp.float32(1.0 / math.sqrt(d_k))

    for n in range(N):                                             # static unroll
        q = q_ref[0, n] * scale                                    # (S, d_k)
        k = k_ref[0, n]                                            # (S, d_k)
        v = v_ref[0, n]                                            # (S, d_v)

        # Q @ K^T without materializing a transposed K (contract last dims).
        s = jax.lax.dot_general(q, k, (((1,), (1,)), ((), ())),
                                preferred_element_type=jnp.float32)  # (S, S)
        s = jnp.where(mask != 0, jnp.float32(-1e9), s)             # masked_fill_

        m = jnp.max(s, axis=-1, keepdims=True)
        p = jnp.exp(s - m)
        p = p * pl.reciprocal(jnp.sum(p, axis=-1, keepdims=True), approx=True)

        # lane-dense column write: head n -> columns [n*d_v, (n+1)*d_v)
        concat_ref[:, n * d_v:(n + 1) * d_v] = jnp.dot(
            p, v, preferred_element_type=jnp.float32)

    c = concat_ref[...]                                            # (S, N*d_v)
    res = resid_ref[0]                                             # (S, D)

    o = jnp.dot(c, wo_ref[...], preferred_element_type=jnp.float32) + bo_ref[...]
    h = _layernorm(o + res, g1_ref[...], be1_ref[...])             # attn output

    f = jnp.maximum(
        jnp.dot(h, w1_ref[...], preferred_element_type=jnp.float32) + b1_ref[...],
        0.0)                                                       # ReLU
    f2 = jnp.dot(f, w2_ref[...], preferred_element_type=jnp.float32) + b2_ref[...]

    out_ref[0] = _layernorm(f2 + h, g2_ref[...], be2_ref[...])


# ----------------------------- wrapper -------------------------------------- #

def encoder_sublayer(x, mask, params):
    """x: (B, S, D) f32; mask: (B, S, S) int32 (nonzero -> masked)."""
    B, S, D = x.shape
    N, d_k, d_v, d_ff = params["N"], params["d_k"], params["d_v"], params["d_ff"]
    nq = N * d_k
    nk = N * d_k
    nv = N * d_v
    ntot = nq + nk + nv

    # fuse the three projection weights into one [D, N*(2*d_k+d_v)] matrix
    w_qkv = jnp.concatenate([params["wq"], params["wk"], params["wv"]], axis=1)
    b_qkv = jnp.concatenate([params["bq"], params["bk"], params["bv"]], axis=1)

    def full_spec(arr):
        nd = arr.ndim
        return pl.BlockSpec(arr.shape, lambda b, nd=nd: (0,) * nd)

    # ---- kernel 1: fused QKV projection (grid over batch) ----
    qkv = pl.pallas_call(
        _qkv_kernel,
        out_shape=jax.ShapeDtypeStruct((B, S, ntot), jnp.float32),
        grid=(B,),
        in_specs=[
            pl.BlockSpec((1, S, D), lambda b: (b, 0, 0)),
            full_spec(w_qkv),
            full_spec(b_qkv),
        ],
        out_specs=pl.BlockSpec((1, S, ntot), lambda b: (b, 0, 0)),
        compiler_params=pltpu.CompilerParams(dimension_semantics=("parallel",)),
    )(x, w_qkv, b_qkv)

    # glue: reproduce torch's `.view(batch, N, -1, d_k)` head split
    # (row-major reshape; no transpose involved)
    qh = qkv[:, :, :nq].reshape(B, N, S, d_k)
    kh = qkv[:, :, nq:nq + nk].reshape(B, N, S, d_k)
    vh = qkv[:, :, nq + nk:].reshape(B, N, S, d_v)

    # ---- kernel 2: attention + W_O + LN + FFN + LN, all fused (grid over batch) ----
    out = pl.pallas_call(
        functools.partial(_attn_ffn_kernel, N=N, d_k=d_k, d_v=d_v),
        out_shape=jax.ShapeDtypeStruct((B, S, D), jnp.float32),
        grid=(B,),
        in_specs=[
            pl.BlockSpec((1, N, S, d_k), lambda b: (b, 0, 0, 0)),
            pl.BlockSpec((1, N, S, d_k), lambda b: (b, 0, 0, 0)),
            pl.BlockSpec((1, N, S, d_v), lambda b: (b, 0, 0, 0)),
            pl.BlockSpec((1, S, S), lambda b: (b, 0, 0)),   # mask: fetched once/batch
            pl.BlockSpec((1, S, D), lambda b: (b, 0, 0)),   # residual
            full_spec(params["wo"]), full_spec(params["bo"]),
            full_spec(params["ln1_g"]), full_spec(params["ln1_b"]),
            full_spec(params["w1"]), full_spec(params["b1"]),
            full_spec(params["w2"]), full_spec(params["b2"]),
            full_spec(params["ln2_g"]), full_spec(params["ln2_b"]),
        ],
        out_specs=pl.BlockSpec((1, S, D), lambda b: (b, 0, 0)),
        scratch_shapes=[pltpu.VMEM((S, N * d_v), jnp.float32)],   # head-concat buffer
        compiler_params=pltpu.CompilerParams(dimension_semantics=("parallel",)),
    )(qh, kh, vh, mask, x,
      params["wo"], params["bo"], params["ln1_g"], params["ln1_b"],
      params["w1"], params["b1"], params["w2"], params["b2"],
      params["ln2_g"], params["ln2_b"])

    return out


# ----------------------------- reference (pure JAX) ------------------------- #

def encoder_sublayer_ref(x, mask, params):
    B, S, D = x.shape
    N, d_k, d_v = params["N"], params["d_k"], params["d_v"]
    q = x @ params["wq"] + params["bq"]
    k = x @ params["wk"] + params["bk"]
    v = x @ params["wv"] + params["bv"]
    qh = q.reshape(B, N, S, d_k)
    kh = k.reshape(B, N, S, d_k)
    vh = v.reshape(B, N, S, d_v)
    scores = jnp.einsum("bnqd,bnkd->bnqk", qh, kh) / math.sqrt(d_k)
    scores = jnp.where(mask[:, None, :, :] != 0, -1e9, scores)
    p = jax.nn.softmax(scores, axis=-1)
    a = jnp.einsum("bnqk,bnkd->bnqd", p, vh)
    c = jnp.transpose(a, (0, 2, 1, 3)).reshape(B, S, N * d_v)
    o = c @ params["wo"] + params["bo"]

    def ln(t, g, b, eps=1e-5):
        mu = jnp.mean(t, -1, keepdims=True)
        var = jnp.mean((t - mu) ** 2, -1, keepdims=True)
        return (t - mu) / jnp.sqrt(var + eps) * g + b

    h = ln(o + x, params["ln1_g"], params["ln1_b"])
    f = jnp.maximum(h @ params["w1"] + params["b1"], 0.0)
    f2 = f @ params["w2"] + params["b2"]
    return ln(f2 + h, params["ln2_g"], params["ln2_b"])


# ----------------------------- main ----------------------------------------- #

if __name__ == "__main__":
    # small shapes consistent with the module
    B, S = 2, 8
    N, d_k, d_v, d_model, d_ff = 4, 8, 8, 32, 64

    key = jax.random.PRNGKey(0)
    ks = jax.random.split(key, 16)

    def lin(kw, kb, fan_in, fan_out):
        bound = 1.0 / math.sqrt(fan_in)
        w = jax.random.uniform(kw, (fan_in, fan_out), jnp.float32, -bound, bound)
        b = jax.random.uniform(kb, (1, fan_out), jnp.float32, -bound, bound)
        return w, b

    wq, bq = lin(ks[0], ks[1], d_model, N * d_k)
    wk, bk = lin(ks[2], ks[3], d_model, N * d_k)
    wv, bv = lin(ks[4], ks[5], d_model, N * d_v)
    wo, bo = lin(ks[6], ks[7], N * d_v, d_model)
    w1, b1 = lin(ks[8], ks[9], d_model, d_ff)
    w2, b2 = lin(ks[10], ks[11], d_ff, d_model)

    params = dict(
        N=N, d_k=d_k, d_v=d_v, d_ff=d_ff,
        wq=wq, bq=bq, wk=wk, bk=bk, wv=wv, bv=bv, wo=wo, bo=bo,
        ln1_g=jnp.ones((1, d_model), jnp.float32),
        ln1_b=jnp.zeros((1, d_model), jnp.float32),
        w1=w1, b1=b1, w2=w2, b2=b2,
        ln2_g=jnp.ones((1, d_model), jnp.float32),
        ln2_b=jnp.zeros((1, d_model), jnp.float32),
    )

    x = jax.random.normal(ks[12], (B, S, d_model), jnp.float32)
    # padding-style mask: mask[b, i, j] = 1 where key position j is padded
    valid = jnp.array([S, S - 2], dtype=jnp.int32)
    cols = jnp.arange(S)[None, None, :]
    mask = (cols >= valid[:, None, None]).astype(jnp.int32)
    mask = jnp.broadcast_to(mask, (B, S, S))

    out = encoder_sublayer(x, mask, params)
    out = jax.block_until_ready(out)

    ref = encoder_sublayer_ref(x, mask, params)
    assert out.shape == (B, S, d_model)
    # tolerance loosened slightly to 1e-3: the softmax denominator uses the EUP
    # approximate reciprocal (pl.reciprocal(approx=True)).
    assert jnp.allclose(out, ref, atol=1e-3, rtol=1e-3), "mismatch vs pure-JAX reference"

    print("KERNEL_OK")
</pallas_src>

<mosaic_0001>
module attributes {stable_mosaic.version = 11 : i64} {
  func.func @_qkv_kernel(%arg0: i32, %arg1: memref<1x8x32xf32, #tpu.memory_space<vmem>>, %arg2: memref<32x96xf32, #tpu.memory_space<vmem>>, %arg3: memref<1x96xf32, #tpu.memory_space<vmem>>, %arg4: memref<1x8x96xf32, #tpu.memory_space<vmem>>) attributes {dimension_semantics = [#tpu.dimension_semantics<parallel>], iteration_bounds = array<i64: 2>, scalar_prefetch = 0 : i64, scratch_operands = 0 : i64, tpu.core_type = #tpu.core_type<tc>, window_params = [{transform_indices = @transform_0, window_bounds = array<i64: 1, 8, 32>}, {pipeline_mode = #tpu.pipeline_mode<synchronous>, transform_indices = @transform_1, window_bounds = array<i64: 32, 96>}, {pipeline_mode = #tpu.pipeline_mode<synchronous>, transform_indices = @transform_2, window_bounds = array<i64: 1, 96>}, {transform_indices = @transform_3, window_bounds = array<i64: 1, 8, 96>}]} {
    %c0 = arith.constant 0 : index
    %c0_0 = arith.constant 0 : index
    %c0_1 = arith.constant 0 : index
    %0 = vector.load %arg1[%c0, %c0_0, %c0_1] : memref<1x8x32xf32, #tpu.memory_space<vmem>>, vector<1x8x32xf32>
    %1 = vector.shape_cast %0 : vector<1x8x32xf32> to vector<8x32xf32>
    %c0_2 = arith.constant 0 : index
    %c0_3 = arith.constant 0 : index
    %2 = vector.load %arg2[%c0_2, %c0_3] : memref<32x96xf32, #tpu.memory_space<vmem>>, vector<32x96xf32>
    %cst = arith.constant dense<0.000000e+00> : vector<8x96xf32>
    %3 = tpu.matmul %1, %2, %cst {dimension_numbers = #tpu.dot_dimension_numbers<[1], [0], [0], [1], [0, 0, 1, 1], [], []>} : vector<8x32xf32>, vector<32x96xf32>, vector<8x96xf32> -> vector<8x96xf32>
    %c0_4 = arith.constant 0 : index
    %c0_5 = arith.constant 0 : index
    %4 = vector.load %arg3[%c0_4, %c0_5] : memref<1x96xf32, #tpu.memory_space<vmem>>, vector<1x96xf32>
    %5 = vector.broadcast %4 : vector<1x96xf32> to vector<8x96xf32>
    %6 = arith.addf %3, %5 : vector<8x96xf32>
    %c0_6 = arith.constant 0 : index
    %c0_7 = arith.constant 0 : index
    %c0_8 = arith.constant 0 : index
    %7 = vector.load %arg4[%c0_6, %c0_7, %c0_8] : memref<1x8x96xf32, #tpu.memory_space<vmem>>, vector<1x8x96xf32>
    %8 = vector.shape_cast %7 : vector<1x8x96xf32> to vector<8x96xf32>
    %9 = vector.shape_cast %6 : vector<8x96xf32> to vector<1x8x96xf32>
    tpu.vector_store %arg4[%c0_6, %c0_7, %c0_8], %9 {strides = array<i32>} : memref<1x8x96xf32, #tpu.memory_space<vmem>>, vector<1x8x96xf32>,
    return
  }
  func.func @transform_0(%arg0: i32) -> (i32, i32, i32) {
    %c0_i32 = arith.constant 0 : i32
    %c0_i32_0 = arith.constant 0 : i32
    %c0_i32_1 = arith.constant 0 : i32
    return %arg0, %c0_i32, %c0_i32_0 : i32, i32, i32
  }
  func.func @transform_1(%arg0: i32) -> (i32, i32) {
    %c0_i32 = arith.constant 0 : i32
    %c0_i32_0 = arith.constant 0 : i32
    %c0_i32_1 = arith.constant 0 : i32
    return %c0_i32, %c0_i32_0 : i32, i32
  }
  func.func @transform_2(%arg0: i32) -> (i32, i32) {
    %c0_i32 = arith.constant 0 : i32
    %c0_i32_0 = arith.constant 0 : i32
    %c0_i32_1 = arith.constant 0 : i32
    return %c0_i32, %c0_i32_0 : i32, i32
  }
  func.func @transform_3(%arg0: i32) -> (i32, i32, i32) {
    %c0_i32 = arith.constant 0 : i32
    %c0_i32_0 = arith.constant 0 : i32
    %c0_i32_1 = arith.constant 0 : i32
    return %arg0, %c0_i32, %c0_i32_0 : i32, i32, i32
  }
}

</mosaic_0001>

<bundles_post_ra>
// kernel: tpu_custom_call.1
= control target key start
LH: loop header
LB: loop body
LE: loop exit
PB: predicated region body
PF: predicated region fallthrough
CT: control target
= control target key end

     0   :  { %8 = vsyncpa [#allocation3], 0  ;;  %s840_s0 = inlined_call_operand.hbm [shape: f32[2,8,32], index: 0, kind: input, shape index: {}]   ;;  %s841_s1 = inlined_call_operand.hbm [shape: f32[32,96], index: 1, kind: input, shape index: {}]   ;;  %s842_s2 = inlined_call_operand.vmem [shape: f32[1,96], index: 2, kind: input, shape index: {}]   ;;  %s843_s3 = inlined_call_operand.hbm [shape: f32[2,8,96], index: 3, kind: output, shape index: {}]  }
   0x1   :  { %10 = vsyncpa [#allocation3 + $0x1], 0 }
   0x2   :  { %11 = vsyncpa [#allocation6], 0 }
   0x3   :  { %12 = vsyncpa [#allocation4], 0 }
   0x4   :  { %14 = vsyncpa [#allocation4 + $0x1], 0  ;;  %s641_s12 = smov 0   ;;  %s643_s13 = smov 0  }
   0x5   :  { %s645_s14 = smov 0   ;;  %s647_s15 = smov 0  }
   0x6 LB: > { %s662_s16 = sadd.s32 4294967295, %s611_s15   ;;  %s383_s17 = sadd.s32 4294967294, %s611_s15   ;;  %s611_s15 = sphi %s647_s15, %s863_s15   ;;  %s607_s14 = sphi %s645_s14, %s862_s14   ;;  %s603_s13 = sphi %s643_s13, %s861_s13   ;;  %s599_s12 = sphi %s641_s12, %s860_s12  }
   0x7   : > { %p40_p0 = scmp.ne.s32.totalorder %s603_s13, %s599_s12  ;;  %p844_p1 = scmp.eq.s32.totalorder %s662_s16, 0 }
   0x8   : > { %p112_p3 = scmp.eq.s32.totalorder %s383_s17, 1  ;;  %p384_p5 = scmp.ge.s32.totalorder %s611_s15, 1 }
   0x9   : > { %p671_p4 = por %p844_p1, %p40_p0  ;;  %p119_p7 = scmp.lt.s32.totalorder %s611_s15, 3 }
   0xa   : > { %p676_p6 = por %p112_p3, %p40_p0  ;;  %s613_s21 = smov [#allocation5]  }
   0xb   : > { %s847_s18 = scalar_select %p671_p4, 1, 0 }
   0xc   : > { %s848_s19 = scalar_select %p676_p6, 1, 0 }
   0xd   : > { %p681_p8 = pnand %p384_p5, %p119_p7  ;;  %s131_s22 = sshll.u32 %s613_s21, 4  ;;  %s685_s22 = int_to_ptr.vmem [resolvable:$true] %s131_s22 }
   0xe   : > { %s697_s24 = sadd.s32 1, %s611_s15   ;;  %s27_s25 = sadd.s32 1, %s607_s14 }
   0xf   : > { %s849_s20 = scalar_select %p681_p8, 1, 0 }
  0x10   : > { %p429_p9 = pneg %p681_p8  ;;  %s24_s26 = ssub.s32 %s611_s15, %s697_s24 }
  0x11   : > { %s483_s29 = scalar_lea.hbm %s841_s1, 512 }
  0x12   : > { %p692_p11 = pnand %p429_p9, %p844_p1  ;;  %p484_p12 = scmp.ne.s32.totalorder %s841_s1, %s483_s29 }
  0x13   : > { %p490_p5 = scmp.lt.u32.totalorder %s483_s29, %s841_s1 }
  0x14   : > { %p485_p13 = pneg %p692_p11 }
  0x16   : > { %p486_p0 = pnand %p485_p13, %p484_p12 }
  0x18   : > { %p487_p3 = pneg %p486_p0 }
  0x1a   : > { %p492_p7 = pnand %p490_p5, %p487_p3 }
  0x1c   : > { %495 = shalt.err (!%p492_p7)
}
  0x1d   : > { %s496_s7 = scalar_lea.vmem %s685_s22, 512  ;;  %p504_p2 = scmp.lt.s32.totalorder %s685_s22, %s685_s22 }
  0x1e   : > { %p497_p9 = scmp.ne.s32.totalorder %s685_s22, %s496_s7  ;;  %p505_p6 = scmp.lt.s32.totalorder %s496_s7, %s496_s7 }
  0x20   : > { %p499_p10 = pnand %p497_p9, %p485_p13  ;;  %p506_p4 = por %p505_p6, %p504_p2 }
  0x22   : > { %p500_p1 = pneg %p499_p10 }
  0x24   : > { %p507_p8 = pnand %p506_p4, %p500_p1 }
  0x26   : > { %510 = shalt.err (!%p507_p8)
}
  0x27   : > { %s614_s8 = smov 128   ;;  %s615_s9 = smov 8  }
  0x28   : > { %432 = dma.hbm_to_vmem [thread:$0]  (!%p692_p11), %s841_s1, 512, %s685_s22, [#allocation6], %s614_s8, %s614_s8, %s615_s9  }
  0x29   : > { %p25_p2 = scmp.eq.s32.totalorder %s24_s26, 0  ;;  %p34_p1 = scmp.ne.s32.totalorder %s607_s14, %s603_s13 }
  0x2a   : > { %p35_p4 = scmp.eq.s32.totalorder %s611_s15, 0  ;;  %p442_p6 = scmp.lt.s32.totalorder %s611_s15, 2 }
  0x2b   : > { %s728_s17 = scalar_select %p25_p2, %s607_s14, %s27_s25  }
  0x2c   : > { %p36_p8 = por %p35_p4, %p34_p1  ;;  %p851_p10 = scmp.eq.s32.totalorder %s662_s16, 1 }
  0x2d   : > { %s148_s27 = sand.u32 1, %s607_s14   ;;  %s388_s28 = sshll.u32 %s611_s15, 7 }
  0x2e   : > { %p732_p12 = por %p851_p10, %p34_p1  ;;  %s387_s29 = sshll.u32 %s148_s27, 3 }
  0x2f   : > { %s741_s4 = scalar_lea.hbm %s840_s0, %s388_s28  ;;  %s152_s22 = scalar_lea.vmem [#allocation2], %s387_s29 }
  0x30   : > { %s159_s25 = sshll.u32 %s152_s22, 4  ;;  %p743_p11 = pnand %p442_p6, %p36_p8  ;;  %s747_s25 = int_to_ptr.vmem [resolvable:$true] %s159_s25 }
  0x31   : > { %s149_s5 = scalar_lea.sflag [#allocation3], %s148_s27  ;;  %s511_s6 = scalar_lea.hbm %s741_s4, 128 }
  0x32   : > { %p512_p13 = scmp.ne.s32.totalorder %s741_s4, %s511_s6  ;;  %p513_p0 = pneg %p743_p11 }
  0x33   : > { %s516_s9 = scalar_lea.hbm %s840_s0, 256  ;;  %p517_p7 = scmp.lt.u32.totalorder %s741_s4, %s840_s0 }
  0x34   : > { %p514_p3 = pnand %p513_p0, %p512_p13  ;;  %p518_p9 = scmp.lt.u32.totalorder %s516_s9, %s511_s6 }
  0x35   : > { %p520_p1 = scmp.lt.u32.totalorder %s511_s6, %s741_s4 }
  0x36   : > { %p515_p5 = pneg %p514_p3  ;;  %p519_p2 = por %p518_p9, %p517_p7 }
  0x38   : > { %p521_p4 = por %p520_p1, %p519_p2 }
  0x3a   : > { %p522_p6 = pnand %p521_p4, %p515_p5 }
  0x3c   : > { %525 = shalt.err (!%p522_p6)
}
  0x3d   : > { %s526_s27 = scalar_lea.vmem %s747_s25, 128  ;;  %s616_s28 = smov [#allocation2]  }
  0x3e   : > { %p527_p8 = scmp.ne.s32.totalorder %s747_s25, %s526_s27  ;;  %s531_s29 = sshll.u32 %s616_s28, 4  ;;  %s532_s29 = int_to_ptr.vmem [resolvable:$false] %s531_s29 }
  0x3f   : > { %s533_s23 = scalar_lea.vmem %s532_s29, 256  ;;  %p534_p3 = scmp.lt.s32.totalorder %s747_s25, %s532_s29 }
  0x40   : > { %p529_p10 = pnand %p527_p8, %p513_p0  ;;  %p535_p7 = scmp.lt.s32.totalorder %s533_s23, %s526_s27 }
  0x42   : > { %p530_p13 = pneg %p529_p10  ;;  %p536_p9 = por %p535_p7, %p534_p3 }
  0x44   : > { %p537_p2 = pnand %p536_p9, %p530_p13 }
  0x46   : > { %540 = shalt.err (!%p537_p2)
}
  0x47   : > { %436 = dma.hbm_to_vmem [thread:$0]  (!%p743_p11), %s741_s4, 128, %s747_s25, %s149_s5  }
  0x48   : > { %p854_p5 = scmp.ne.s32.totalorder %s849_s20, 0 }
  0x49   : > { %s777_s30 = sand.u32 (!%p854_p5), 1, %s603_s13   ;;  %p855_p0 = scmp.ne.s32.totalorder (!%p854_p5), %s847_s18, 0 }
  0x4a   : > { %168 = sbr.rel (%p854_p5) target bundleno = 323 (0x143), region = 32  ;;  %s390_s22 = sshll.u32 (!%p854_p5), %s777_s30, 3 }
  0x4b   : > { %s171_s6 = scalar_lea.sflag (!%p854_p5), [#allocation3], %s777_s30  ;;  %s174_s7 = scalar_lea.vmem (!%p854_p5), [#allocation2], %s390_s22 }
  0x51   : > { %586 = dma.done.wait (%p855_p0), %s171_s6, 128  }
  0x52   : > { %588 = vsyncadd (%p855_p0), %s171_s6, 4294967168  ;;  %p856_p1 = scmp.eq.s32.totalorder %s662_s16, 0 }
  0x54   : > { %590 = dma.done.wait (%p856_p1), [#allocation6], 512   ;;  %p857_p11 = pmov %p856_p1 }
  0x55   : > { %v617_v0 = vmov 0.0|0.0   ;;  %vm618_vm0 = vmmov 0   ;;  %v619_v1 = vmov 0.0   ;;  %v202_v2 = vld [vmem:[#allocation5] sm:$0xff]  ;;  %v203_v3 = vld [vmem:[#allocation5 + $0x8] sm:$0xff]  ;;  %v204_v4 = vld [vmem:[#allocation5 + $0x10] sm:$0xff] }
  0x56   : > { %592 = vsyncadd (%p857_p11), [#allocation6], 4294966784  ;;  %415 = vmatprep.subr.bf16.mxu0 %v617_v0  ;;  %412 = vmatprep.mubr.msk.f32.mxu0 %vm618_vm0, %v619_v1  ;;  %v416_v5 = vpack.c.bf16 %v203_v3, %v202_v2  ;;  %v205_v6 = vld [vmem:[#allocation5 + $0x18] sm:$0xff]  ;;  %vm213_vm1 = vcmask 261120   ;;  %v393_v9 = vld [vmem:[%s842_s2] ss:$0 sm:$0xff] }
  0x57   : > { %v419_v7 = vpack.c.bf16 %v205_v6, %v204_v4  ;;  %v201_v8 = vld [vmem:[%s174_s7] sm:$0xff]  ;;  %s396_s4 = sshll.u32 %s662_s16, 7  ;;  %s200_s25 = scalar_lea.vmem [#allocation7], %s390_s22  ;;  %vm287_vm2 = vcmask 785408  }
  0x58   : > { %417 = vmatpush3.bf16.msra.mxu0 %v416_v5  ;;  %s303_s26 = sshll.u32 %s200_s25, 4  ;;  %s796_s9 = scalar_lea.hbm %s843_s3, %s396_s4  ;;  %s798_s26 = int_to_ptr.vmem [resolvable:$true] %s303_s26 }
  0x59   : > { %418 = vmatprep.subr.bf16.mxu0 %v617_v0  ;;  %s290_s10 = scalar_lea.sflag [#allocation4], %s777_s30  ;;  %s541_s11 = scalar_lea.vmem %s798_s26, 128 }
  0x5a   : > { %p542_p4 = scmp.ne.s32.totalorder %s798_s26, %s541_s11  ;;  %s620_s16 = smov [#allocation7]  }
  0x5b   : > { %s545_s27 = sshll.u32 %s620_s16, 4  ;;  %s546_s27 = int_to_ptr.vmem [resolvable:$false] %s545_s27 }
  0x5c   : > { %420 = vmatpush3.bf16.msra.mxu0 %v419_v7  ;;  %p543_p6 = pnand %p542_p4, %p732_p12  ;;  %s547_s28 = scalar_lea.vmem %s546_s27, 256 }
  0x5d   : > { %p548_p10 = scmp.lt.s32.totalorder %s798_s26, %s546_s27  ;;  %p549_p13 = scmp.lt.s32.totalorder %s547_s28, %s541_s11 }
  0x5e   : > { %p544_p8 = pneg %p543_p6 }
  0x5f   : > { %413 = vmatmul.mubr.msk.f32.vlgmr.msra.gmra.mrb[0].mxu0 %vm213_vm1, %v201_v8  ;;  %p550_p3 = por %p549_p13, %p548_p10 }
  0x61   : > { %p551_p7 = pnand %p550_p3, %p544_p8 }
 0x132   : > { %v283_v10 = vpop.f32.mrb[0].mxu0 }
 0x133   : > { %v284_v11 = vadd.f32 %v393_v9, %v283_v10  ;;  %v414_v12 = vpop.f32.mrb[1].mxu0 }
 0x135   : > { %288 = vst.msk [vmem:[%s200_s25] sm:$0xff] %vm287_vm2, %v284_v11 }
 0x136   : > { %554 = shalt.err (!%p551_p7)
}
 0x137   : > { %s555_s29 = scalar_lea.hbm %s796_s9, 128  ;;  %s559_s22 = scalar_lea.hbm %s843_s3, 256 }
 0x138   : > { %p556_p9 = scmp.ne.s32.totalorder %s796_s9, %s555_s29  ;;  %p560_p0 = scmp.lt.u32.totalorder %s796_s9, %s843_s3 }
 0x139   : > { %p561_p1 = scmp.lt.u32.totalorder %s559_s22, %s555_s29  ;;  %p563_p4 = scmp.lt.u32.totalorder %s555_s29, %s796_s9 }
 0x13a   : > { %p557_p2 = pnand %p556_p9, %p732_p12 }
 0x13b   : > { %p562_p11 = por %p561_p1, %p560_p0 }
 0x13c   : > { %p558_p5 = pneg %p557_p2 }
 0x13d   : > { %p564_p6 = por %p563_p4, %p562_p11 }
 0x13f   : > { %p565_p8 = pnand %p564_p6, %p558_p5 }
 0x141   : > { %568 = shalt.err (!%p565_p8)
}
 0x142   : > { %427 = dma.vmem_to_hbm [thread:$0]  (%p732_p12), %s798_s26, 128, %s796_s9, %s290_s10  }
 0x143 PF: > { %s315_s18 = sand.u32 1, %s599_s12   ;;  %p858_p10 = scmp.ne.s32.totalorder %s848_s19, 0 }
 0x144   : > { %p859_p13 = scmp.ge.s32.totalorder %s611_s15, 2  ;;  %s316_s20 = scalar_lea.sflag [#allocation4], %s315_s18 }
 0x146   : > { %p438_p3 = pnand %p859_p13, %p858_p10 }
 0x148   : > { %594 = dma.done.wait (!%p438_p3), %s316_s20, 128  }
 0x149   : > { %596 = vsyncadd (!%p438_p3), %s316_s20, 4294967168  ;;  %p17_p7 = scmp.ge.s32.totalorder %s697_s24, 4   ;;  %s860_s12 = smov %s603_s13 }
 0x14a   : > { %s861_s13 = smov %s607_s14  ;;  %s862_s14 = smov %s728_s17 }
 0x14b   : > { %s863_s15 = smov %s697_s24  ;;  %19 = sbr.rel (!%p17_p7) target bundleno = 6 (0x6), region = 81 }
 0x152   :  { %321 = vsyncpa [#allocation3], 1 }
 0x153   :  { %323 = vsyncpa [#allocation3 + $0x1], 1 }
 0x154   :  { %324 = vsyncpa [#allocation6], 1 }
 0x155   :  { %325 = vsyncpa [#allocation4], 1 }
 0x156   :  { %327 = vsyncpa [#allocation4 + $0x1], 1 }

</bundles_post_ra>
